<compile_context>
chip_gen: v5e
topology: v5e:2x2
jax: 0.10.0
libtpu: 0.0.40
codegen_flags: <defaults>
</compile_context>

<pallas_src>
import jax
import jax.numpy as jnp
from jax.experimental import pallas as pl
from jax.experimental.pallas import tpu as pltpu

# ---- model / problem sizes (small, consistent with the module) ----
B = 2          # batch
C = 4          # channels
H = W = 16     # spatial
P = 4          # patch size
N = (H // P) * (W // P)   # 16 patches per image
PD = C * P * P            # 64 = flattened patch dim
D = 32                    # embed_dim (context_encoder.dim)
NC = N // 2               # 8 context patches
NT = N - NC               # 8 target patches
BN = B * N                # 32 rows through the MXU


def jepa_kernel(patches_ref, w_ref, b_ref, y_ref):
    """Single invocation, single MXU push: y = gelu(patches @ W_fold + b_fold)."""
    acc = jnp.dot(patches_ref[...], w_ref[...],
                  preferred_element_type=jnp.float32)        # (BN, 2D) f32 acc
    # f32 bias add + GELU epilogue (v5e has no bf16 VPU/EUP); (1, 2D) broadcasts
    # over the 32 sublane rows.
    y_ref[...] = jax.nn.gelu(acc + b_ref[...], approximate=True)


def _patchify(x):
    """NCHW -> (B*N, C*P*P), flatten order (C, p, p), like a Conv2d patch embed."""
    xb = x.reshape(B, C, H // P, P, W // P, P)
    xb = jnp.transpose(xb, (0, 2, 4, 1, 3, 5))       # (B, H/P, W/P, C, P, P)
    return xb.reshape(BN, PD)


def pack_params(params):
    """Fold the 9 module parameters into 3 kernel operands + 1 precomputed pred.

    Done once, offline, in f32; only the folded matmul weight is cast to bf16.
    """
    (w_emb, b_emb, w_ce, b_ce, w_te, b_te, w_pr, b_pr, mask_tok) = params
    w_cet = jnp.concatenate([w_ce, w_te], axis=1)                     # (D, 2D) f32
    w_fold = jnp.dot(w_emb, w_cet).astype(jnp.bfloat16)               # (PD, 2D) bf16
    b_fold = jnp.dot(b_emb, w_cet) + jnp.concatenate([b_ce, b_te], axis=1)  # (1, 2D)
    # Input-independent predictor output (per-token Linear on the mask token).
    pred = jnp.dot(mask_tok, w_pr) + b_pr                             # (1, D) f32
    return (w_fold, b_fold, pred)


_COST = pl.CostEstimate(
    flops=2 * BN * PD * (2 * D),                 # one (32,64)@(64,64) matmul
    transcendentals=BN * 2 * D,                  # tanh in the GELU epilogue
    bytes_accessed=(BN * PD * 2                  # patches bf16
                    + PD * 2 * D * 2             # W_fold bf16
                    + 2 * D * 4                  # b_fold f32
                    + BN * 2 * D * 4),           # y slab f32
)

_VMEM_SPEC = pl.BlockSpec(memory_space=pltpu.MemorySpace.VMEM)


@jax.jit
def jepa_forward(x, packed_params):
    """x: (B, C, H, W) float32 NCHW. Returns (preds, x_targets, context_encoded)."""
    w_fold, b_fold, pred = packed_params
    patches = _patchify(x).astype(jnp.bfloat16)                       # (BN, PD) bf16

    y_flat = pl.pallas_call(
        jepa_kernel,
        out_shape=jax.ShapeDtypeStruct((BN, 2 * D), jnp.float32),     # (32, 64) slab
        in_specs=[_VMEM_SPEC, _VMEM_SPEC, _VMEM_SPEC],
        out_specs=_VMEM_SPEC,
        compiler_params=pltpu.CompilerParams(
            # let XLA fuse the patchify transpose + bf16 cast into operand 0
            allow_input_fusion=[True, False, False],
        ),
        cost_estimate=_COST,
    )(patches, w_fold, b_fold)

    # ---- pure layout plumbing (outside the kernel) ----
    y = y_flat.reshape(B, N, 2 * D)
    context_encoded = y[:, :NC, :D]        # context rows through the w_ce columns
    x_targets = y[:, NC:, D:]              # target rows through the w_te columns
    preds = jnp.broadcast_to(pred[None, :, :], (B, NT, D))
    return preds, x_targets, context_encoded


def jepa_reference(x, packed_params):
    """Pure-JAX replica of the kernel math (same folded params / casts)."""
    w_fold, b_fold, pred = packed_params
    patches = _patchify(x).astype(jnp.bfloat16)
    y = jax.nn.gelu(
        jnp.dot(patches, w_fold, preferred_element_type=jnp.float32) + b_fold,
        approximate=True).reshape(B, N, 2 * D)
    context_encoded = y[:, :NC, :D]
    x_targets = y[:, NC:, D:]
    preds = jnp.broadcast_to(pred[None, :, :], (B, NT, D))
    return preds, x_targets, context_encoded


def init_params(key):
    ks = jax.random.split(key, 9)
    scale_emb = 1.0 / jnp.sqrt(PD)
    scale_d = 1.0 / jnp.sqrt(D)
    w_emb = jax.random.normal(ks[0], (PD, D), jnp.float32) * scale_emb
    b_emb = jax.random.normal(ks[1], (1, D), jnp.float32) * 0.01
    w_ce = jax.random.normal(ks[2], (D, D), jnp.float32) * scale_d
    b_ce = jax.random.normal(ks[3], (1, D), jnp.float32) * 0.01
    w_te = jax.random.normal(ks[4], (D, D), jnp.float32) * scale_d
    b_te = jax.random.normal(ks[5], (1, D), jnp.float32) * 0.01
    w_pr = jax.random.normal(ks[6], (D, D), jnp.float32) * scale_d
    b_pr = jax.random.normal(ks[7], (1, D), jnp.float32) * 0.01
    # torch.nn.Parameter(torch.randn(1, 1, embed_dim)) -> stored as (1, D)
    mask_tok = jax.random.normal(ks[8], (1, D), jnp.float32)
    return (w_emb, b_emb, w_ce, b_ce, w_te, b_te, w_pr, b_pr, mask_tok)


if __name__ == "__main__":
    key = jax.random.PRNGKey(0)
    k_x, k_p = jax.random.split(key)
    x = jax.random.normal(k_x, (B, C, H, W), jnp.float32)
    params = init_params(k_p)
    packed = pack_params(params)

    outs = jax.block_until_ready(jepa_forward(x, packed))
    preds, x_targets, context_encoded = outs

    assert preds.shape == (B, NT, D)
    assert x_targets.shape == (B, NT, D)
    assert context_encoded.shape == (B, NC, D)

    ref_outs = jepa_reference(x, packed)
    for got, want in zip(outs, ref_outs):
        assert jnp.allclose(got, want, rtol=1e-3, atol=1e-3), "kernel/reference mismatch"

    print("KERNEL_OK")
</pallas_src>

<mosaic_0001>
module attributes {stable_mosaic.version = 11 : i64} {
  func.func @jepa_kernel(%arg0: memref<32x64xbf16, #tpu.memory_space<vmem>>, %arg1: memref<64x64xbf16, #tpu.memory_space<vmem>>, %arg2: memref<1x64xf32, #tpu.memory_space<vmem>>, %arg3: memref<32x64xf32, #tpu.memory_space<vmem>>) attributes {dimension_semantics = [], scalar_prefetch = 0 : i64, scratch_operands = 0 : i64, tpu.core_type = #tpu.core_type<tc>} {
    %c0 = arith.constant 0 : index
    %c0_0 = arith.constant 0 : index
    %0 = vector.load %arg0[%c0, %c0_0] : memref<32x64xbf16, #tpu.memory_space<vmem>>, vector<32x64xbf16>
    %c0_1 = arith.constant 0 : index
    %c0_2 = arith.constant 0 : index
    %1 = vector.load %arg1[%c0_1, %c0_2] : memref<64x64xbf16, #tpu.memory_space<vmem>>, vector<64x64xbf16>
    %cst = arith.constant dense<0.000000e+00> : vector<32x64xf32>
    %2 = tpu.matmul %0, %1, %cst {dimension_numbers = #tpu.dot_dimension_numbers<[1], [0], [0], [1], [0, 0, 1, 1], [], []>} : vector<32x64xbf16>, vector<64x64xbf16>, vector<32x64xf32> -> vector<32x64xf32>
    %c0_3 = arith.constant 0 : index
    %c0_4 = arith.constant 0 : index
    %3 = vector.load %arg2[%c0_3, %c0_4] : memref<1x64xf32, #tpu.memory_space<vmem>>, vector<1x64xf32>
    %4 = vector.broadcast %3 : vector<1x64xf32> to vector<32x64xf32>
    %5 = arith.addf %2, %4 : vector<32x64xf32>
    %6 = arith.mulf %5, %5 : vector<32x64xf32>
    %7 = arith.mulf %5, %6 : vector<32x64xf32>
    %cst_5 = arith.constant 4.471500e-02 : f32
    %8 = vector.broadcast %cst_5 : f32 to vector<32x64xf32>
    %9 = arith.mulf %8, %7 : vector<32x64xf32>
    %10 = arith.addf %5, %9 : vector<32x64xf32>
    %cst_6 = arith.constant 0.797884583 : f32
    %11 = vector.broadcast %cst_6 : f32 to vector<32x64xf32>
    %12 = arith.mulf %11, %10 : vector<32x64xf32>
    %13 = math.tanh %12 : vector<32x64xf32>
    %cst_7 = arith.constant 1.000000e+00 : f32
    %14 = vector.broadcast %cst_7 : f32 to vector<32x64xf32>
    %15 = arith.addf %14, %13 : vector<32x64xf32>
    %cst_8 = arith.constant 5.000000e-01 : f32
    %16 = vector.broadcast %cst_8 : f32 to vector<32x64xf32>
    %17 = arith.mulf %16, %15 : vector<32x64xf32>
    %18 = arith.mulf %5, %17 : vector<32x64xf32>
    %c0_9 = arith.constant 0 : index
    %c0_10 = arith.constant 0 : index
    %19 = vector.load %arg3[%c0_9, %c0_10] : memref<32x64xf32, #tpu.memory_space<vmem>>, vector<32x64xf32>
    tpu.vector_store %arg3[%c0_9, %c0_10], %18 {strides = array<i32>} : memref<32x64xf32, #tpu.memory_space<vmem>>, vector<32x64xf32>,
    return
  }
}

</mosaic_0001>

<bundles_post_ra>
// kernel: jepa_forward.1
= control target key start
LH: loop header
LB: loop body
LE: loop exit
PB: predicated region body
PF: predicated region fallthrough
CT: control target
= control target key end

     0   :  { %vm65_vm0 = vcmask 523264   ;;  %s239_s1 = inlined_call_operand.vmem [shape: bf16[64,64], index: 1, kind: input, shape index: {}]   ;;  %s240_s2 = inlined_call_operand.vmem [shape: f32[1,64], index: 2, kind: input, shape index: {}]   ;;  %s241_s0 = inlined_call_operand.vmem [shape: bf16[32,64], index: 0, kind: input, shape index: {}]   ;;  %s242_s3 = inlined_call_operand.vmem [shape: f32[32,64], index: 3, kind: output, shape index: {}]  }
   0x1   :  { %v166_v0 = vld [vmem:[%s239_s1 + $0x18] sm:$0xff]  ;;  %v165_v1 = vld [vmem:[%s239_s1 + $0x10] sm:$0xff]  ;;  %v164_v2 = vld [vmem:[%s239_s1 + $0x8] sm:$0xff] }
   0x2   :  { %76 = vmatpush.bf16.msra.mxu0 %v166_v0  ;;  %167 = vmatpush.bf16.msra.mxu1 %v166_v0  ;;  %v163_v3 = vld [vmem:[%s239_s1] sm:$0xff]  ;;  %v162_v5 = vld [vmem:[%s241_s0 + $0x8] sm:$0xff] }
   0x3   :  { %v161_v4 = vld [vmem:[%s241_s0] sm:$0xff] }
   0x4   :  { %v171_v6 = vld [vmem:[%s240_s2] ss:$0 sm:$0xff] }
   0x6   :  { %77 = vmatpush.bf16.msra.mxu0 %v165_v1  ;;  %168 = vmatpush.bf16.msra.mxu1 %v165_v1 }
   0xa   :  { %78 = vmatpush.bf16.msra.mxu0 %v164_v2  ;;  %169 = vmatpush.bf16.msra.mxu1 %v164_v2 }
   0xe   :  { %79 = vmatpush.bf16.msra.mxu0 %v163_v3  ;;  %170 = vmatpush.bf16.msra.mxu1 %v163_v3 }
  0x11   :  { %159 = vmatmul.msk.bf16.vlgmr.msra.gmra.mxu0 %vm65_vm0, %v161_v4  ;;  %160 = vmatmul.msk.bf16.vlgmr.msra.gmra.mxu1 %vm65_vm0, %v162_v5 }
  0x8e   :  { %v81_v7 = vpop.f32.mrf.mxu0  ;;  %v86_v8 = vpop.f32.mrf.mxu1 }
  0x8f   :  { %v82_v9 = vadd.f32 %v171_v6, %v81_v7  ;;  %v87_v10 = vadd.f32 %v171_v6, %v86_v8 }
  0x91   :  { %v91_v11 = vmul.f32 %v82_v9, %v82_v9  ;;  %v93_v12 = vmul.f32 %v87_v10, %v87_v10 }
  0x93   :  { %v95_v13 = vmul.f32 %v91_v11, %v82_v9  ;;  %v97_v14 = vmul.f32 %v93_v12, %v87_v10 }
  0x95   :  { %v99_v15 = vmul.f32 0.044715, %v95_v13  ;;  %v101_v16 = vmul.f32 0.044715, %v97_v14 }
  0x96   :  { %v83_v17 = vpop.f32.mrf.mxu0  ;;  %v88_v18 = vpop.f32.mrf.mxu1 }
  0x97   :  { %v103_v19 = vadd.f32 %v99_v15, %v82_v9  ;;  %v105_v20 = vadd.f32 %v101_v16, %v87_v10  ;;  %v84_v21 = vadd.f32 %v171_v6, %v83_v17  ;;  %v89_v22 = vadd.f32 %v171_v6, %v88_v18 }
  0x99   :  { %v107_v23 = vmul.f32 0.7978846, %v103_v19  ;;  %v109_v24 = vmul.f32 0.7978846, %v105_v20  ;;  %v92_v25 = vmul.f32 %v84_v21, %v84_v21  ;;  %v94_v26 = vmul.f32 %v89_v22, %v89_v22 }
  0x9b   :  { %172 = vtanh.f32 %v107_v23  ;;  %v96_v27 = vmul.f32 %v92_v25, %v84_v21  ;;  %v98_v28 = vmul.f32 %v94_v26, %v89_v22 }
  0x9c   :  { %174 = vtanh.f32 %v109_v24 }
  0x9d   :  { %v100_v29 = vmul.f32 0.044715, %v96_v27  ;;  %v102_v30 = vmul.f32 0.044715, %v98_v28 }
  0x9f   :  { %v104_v31 = vadd.f32 %v100_v29, %v84_v21  ;;  %v106_v32 = vadd.f32 %v102_v30, %v89_v22 }
  0xa1   :  { %v173_v33 = vpop.eup %172  ;;  %v108_v34 = vmul.f32 0.7978846, %v104_v31  ;;  %v110_v35 = vmul.f32 0.7978846, %v106_v32 }
  0xa2   :  { %v175_v36 = vpop.eup %174  ;;  %v115_v37 = vadd.f32 1.0, %v173_v33 }
  0xa3   :  { %v117_v38 = vadd.f32 1.0, %v175_v36  ;;  %176 = vtanh.f32 %v108_v34 }
  0xa4   :  { %v119_v39 = vmul.f32 0.5, %v115_v37  ;;  %178 = vtanh.f32 %v110_v35 }
  0xa5   :  { %v121_v40 = vmul.f32 0.5, %v117_v38 }
  0xa6   :  { %v123_v41 = vmul.f32 %v119_v39, %v82_v9 }
  0xa7   :  { %v125_v42 = vmul.f32 %v121_v40, %v87_v10 }
  0xa8   :  { %127 = vst.msk [vmem:[%s242_s3] sm:$0xff] %vm65_vm0, %v123_v41 }
  0xa9   :  { %v177_v43 = vpop.eup %176  ;;  %129 = vst.msk [vmem:[%s242_s3 + $0x10] sm:$0xff] %vm65_vm0, %v125_v42 }
  0xaa   :  { %v179_v44 = vpop.eup %178  ;;  %v116_v45 = vadd.f32 1.0, %v177_v43 }
  0xab   :  { %v118_v46 = vadd.f32 1.0, %v179_v44 }
  0xac   :  { %v120_v47 = vmul.f32 0.5, %v116_v45 }
  0xad   :  { %v122_v48 = vmul.f32 0.5, %v118_v46 }
  0xae   :  { %v124_v49 = vmul.f32 %v120_v47, %v84_v21 }
  0xaf   :  { %v126_v50 = vmul.f32 %v122_v48, %v89_v22 }
  0xb0   :  { %128 = vst.msk [vmem:[%s242_s3 + $0x8] sm:$0xff] %vm65_vm0, %v124_v49 }
  0xb1   :  { %130 = vst.msk [vmem:[%s242_s3 + $0x18] sm:$0xff] %vm65_vm0, %v126_v50 }

</bundles_post_ra>
